<compile_context>
chip_gen: v5e
topology: v5e:2x2
jax: 0.10.0
libtpu: 0.0.40
codegen_flags: <defaults>
</compile_context>

<pallas_src>
import functools

import jax
import jax.numpy as jnp
from jax.experimental import pallas as pl
from jax.experimental.pallas import tpu as pltpu


def _clip_kernel(boxes_ref, out_ref, *, width, height):
    x = boxes_ref[...]
    dt = x.dtype
    # Lane phase 0..3 selects the coordinate: 0->x1, 1->y1, 2->x2, 3->y2.
    # Lane-block starts are multiples of 4 (bc is a multiple of 128 or the full
    # row), so the local iota has the same phase as the global lane index.
    phase = jax.lax.broadcasted_iota(jnp.int32, x.shape, 1) % 4
    upper = jnp.where(phase == 2, jnp.asarray(width, dt), jnp.asarray(height, dt))
    out_ref[...] = jnp.where(
        phase < 2,
        jnp.maximum(x, jnp.asarray(0, dt)),   # x1, y1 >= 0
        jnp.minimum(x, upper),                # x2 <= W, y2 <= H
    )


def _round_up(x, m):
    return ((x + m - 1) // m) * m


def _choose_blocks(batch, lanes, itemsize, target_bytes=2 << 20):
    """Pick (block_rows, block_lanes) for a (batch, lanes) elementwise op.

    Targets ~`target_bytes` of VMEM per block (sublane dim counted at its
    padded-to-8 size) so in+out double buffers stay <= ~8 MiB (fits every
    generation's default scoped-VMEM), while blocks stay >= ~1-2 MiB so the
    kernel runs at the HBM roofline instead of being per-step-overhead bound.
    """
    # --- sublane (batch) axis: full batch, or a multiple of 8 rows ----------
    rows_budget = max(1, target_bytes // max(1, lanes * itemsize))
    if batch <= rows_budget:
        block_rows = batch                       # full dim (always legal)
    elif rows_budget >= 8:
        block_rows = (rows_budget // 8) * 8
    else:
        block_rows = batch if batch <= 8 else 8
    eff_rows = _round_up(block_rows, 8)          # VMEM pads sublanes to 8

    # --- lane axis: full row, or a 512-aligned chunk fitting the budget -----
    raw = max(1, target_bytes // (eff_rows * itemsize))
    if raw >= 512:
        lanes_budget = (raw // 512) * 512        # unmasked vst even for bf16
    else:
        lanes_budget = max(128, (raw // 128) * 128)
    block_lanes = lanes if lanes <= lanes_budget else lanes_budget

    # --- v7x megacore: keep >=2 blocks on a parallel axis when worthwhile ---
    if (pl.cdiv(batch, block_rows) == 1 and pl.cdiv(lanes, block_lanes) == 1
            and lanes >= 256 and batch * lanes * itemsize >= (256 << 10)):
        align = 512 if lanes >= 1024 else 128
        block_lanes = _round_up((lanes + 1) // 2, align)

    return block_rows, block_lanes


@jax.jit
def clip_boxes(boxes, img):
    """boxes: (B, N, 4); img: (B, C, H, W). Returns clipped boxes (B, N, 4)."""
    B, N, four = boxes.shape
    assert four == 4
    height, width = img.shape[2], img.shape[3]
    n4 = N * 4
    dtype = boxes.dtype

    # Lane-dense view: coordinates map onto the 128-wide lane axis.
    flat = boxes.reshape(B, n4)

    br, bc = _choose_blocks(B, n4, dtype.itemsize)
    grid = (pl.cdiv(B, br), pl.cdiv(n4, bc))

    out = pl.pallas_call(
        functools.partial(_clip_kernel, width=width, height=height),
        out_shape=jax.ShapeDtypeStruct((B, n4), dtype),
        grid=grid,
        in_specs=[pl.BlockSpec((br, bc), lambda i, j: (i, j))],
        out_specs=pl.BlockSpec((br, bc), lambda i, j: (i, j)),
        compiler_params=pltpu.CompilerParams(
            # Only matters on v7x (2 TCs); harmless and free on v5e/v6e.
            dimension_semantics=("parallel", "parallel"),
        ),
    )(flat)

    return out.reshape(B, N, 4)


def _clip_boxes_ref(boxes, height, width):
    x1 = jnp.maximum(boxes[..., 0], 0.0)
    y1 = jnp.maximum(boxes[..., 1], 0.0)
    x2 = jnp.minimum(boxes[..., 2], float(width))
    y2 = jnp.minimum(boxes[..., 3], float(height))
    return jnp.stack([x1, y1, x2, y2], axis=-1)


if __name__ == "__main__":
    key = jax.random.PRNGKey(0)
    kb, ki, kb2 = jax.random.split(key, 3)

    # --- small shape matching the module's example inputs -------------------
    B, N = 2, 8
    C, H, W = 4, 16, 16
    boxes = jax.random.uniform(kb, (B, N, 4), jnp.float32, minval=-8.0, maxval=24.0)
    img = jax.random.normal(ki, (B, C, H, W), dtype=jnp.float32)

    out = jax.block_until_ready(clip_boxes(boxes, img))
    ref = _clip_boxes_ref(boxes, H, W)
    assert out.shape == boxes.shape
    assert jnp.allclose(out, ref), "mismatch vs reference (small shape)"

    # --- moderate shape exercising the tiled / multi-block path -------------
    B2, N2 = 2, 9000
    H2, W2 = 512, 640
    boxes2 = jax.random.uniform(
        kb2, (B2, N2, 4), jnp.float32, minval=-50.0, maxval=700.0
    )
    img2 = jnp.zeros((B2, 1, H2, W2), dtype=jnp.float32)

    out2 = jax.block_until_ready(clip_boxes(boxes2, img2))
    ref2 = _clip_boxes_ref(boxes2, H2, W2)
    assert jnp.allclose(out2, ref2), "mismatch vs reference (tiled shape)"

    print("KERNEL_OK")
</pallas_src>

<mosaic_0001>
module attributes {stable_mosaic.version = 11 : i64} {
  func.func @_clip_kernel(%arg0: i32, %arg1: i32, %arg2: memref<2x32xf32, #tpu.memory_space<vmem>>, %arg3: memref<2x32xf32, #tpu.memory_space<vmem>>) attributes {dimension_semantics = [#tpu.dimension_semantics<parallel>, #tpu.dimension_semantics<parallel>], iteration_bounds = array<i64: 1, 1>, scalar_prefetch = 0 : i64, scratch_operands = 0 : i64, tpu.core_type = #tpu.core_type<tc>, window_params = [{transform_indices = @transform_0, window_bounds = array<i64: 2, 32>}, {transform_indices = @transform_1, window_bounds = array<i64: 2, 32>}]} {
    %c0 = arith.constant 0 : index
    %c0_0 = arith.constant 0 : index
    %0 = vector.load %arg2[%c0, %c0_0] : memref<2x32xf32, #tpu.memory_space<vmem>>, vector<2x32xf32>
    %1 = tpu.iota {dimensions = array<i32: 1>} : vector<2x32xi32>
    %c4_i32 = arith.constant 4 : i32
    %c0_i32 = arith.constant 0 : i32
    %2 = arith.cmpi eq, %c4_i32, %c0_i32 : i32
    %c1_i32 = arith.constant 1 : i32
    %3 = arith.select %2, %c1_i32, %c4_i32 : i32
    %4 = vector.broadcast %3 : i32 to vector<2x32xi32>
    %5 = arith.remsi %1, %4 : vector<2x32xi32>
    %c0_i32_1 = arith.constant 0 : i32
    %6 = vector.broadcast %c0_i32_1 : i32 to vector<2x32xi32>
    %7 = arith.cmpi ne, %5, %6 : vector<2x32xi32>
    %c0_i32_2 = arith.constant 0 : i32
    %8 = vector.broadcast %c0_i32_2 : i32 to vector<2x32xi32>
    %9 = arith.cmpi slt, %5, %8 : vector<2x32xi32>
    %c0_i32_3 = arith.constant 0 : i32
    %10 = arith.cmpi slt, %3, %c0_i32_3 : i32
    %11 = vector.broadcast %10 : i1 to vector<2x32xi1>
    %12 = vector.broadcast %11 : vector<2x32xi1> to vector<2x32xi1>
    %13 = arith.xori %9, %12 : vector<2x32xi1>
    %14 = arith.andi %13, %7 : vector<2x32xi1>
    %15 = vector.broadcast %3 : i32 to vector<2x32xi32>
    %16 = arith.addi %5, %15 : vector<2x32xi32>
    %17 = arith.select %14, %16, %5 : vector<2x32xi1>, vector<2x32xi32>
    %c2_i32 = arith.constant 2 : i32
    %18 = vector.broadcast %c2_i32 : i32 to vector<2x32xi32>
    %19 = arith.cmpi eq, %17, %18 : vector<2x32xi32>
    %cst = arith.constant 1.600000e+01 : f32
    %cst_4 = arith.constant 1.600000e+01 : f32
    %20 = vector.broadcast %cst : f32 to vector<2x32xf32>
    %21 = vector.broadcast %cst_4 : f32 to vector<2x32xf32>
    %22 = arith.select %19, %20, %21 : vector<2x32xi1>, vector<2x32xf32>
    %c2_i32_5 = arith.constant 2 : i32
    %23 = vector.broadcast %c2_i32_5 : i32 to vector<2x32xi32>
    %24 = arith.cmpi slt, %17, %23 : vector<2x32xi32>
    %cst_6 = arith.constant 0.000000e+00 : f32
    %25 = vector.broadcast %cst_6 : f32 to vector<2x32xf32>
    %26 = arith.maximumf %0, %25 : vector<2x32xf32>
    %27 = arith.minimumf %0, %22 : vector<2x32xf32>
    %28 = arith.select %24, %26, %27 : vector<2x32xi1>, vector<2x32xf32>
    %c0_7 = arith.constant 0 : index
    %c0_8 = arith.constant 0 : index
    %29 = vector.load %arg3[%c0_7, %c0_8] : memref<2x32xf32, #tpu.memory_space<vmem>>, vector<2x32xf32>
    tpu.vector_store %arg3[%c0_7, %c0_8], %28 {strides = array<i32>} : memref<2x32xf32, #tpu.memory_space<vmem>>, vector<2x32xf32>,
    return
  }
  func.func @transform_0(%arg0: i32, %arg1: i32) -> (i32, i32) {
    %c0_i32 = arith.constant 0 : i32
    return %arg0, %arg1 : i32, i32
  }
  func.func @transform_1(%arg0: i32, %arg1: i32) -> (i32, i32) {
    %c0_i32 = arith.constant 0 : i32
    return %arg0, %arg1 : i32, i32
  }
}

</mosaic_0001>

<bundles_post_ra>
// kernel: clip_boxes.1
= control target key start
LH: loop header
LB: loop body
LE: loop exit
PB: predicated region body
PF: predicated region fallthrough
CT: control target
= control target key end

     0   :  { %v9_v0 = vlaneseq  ;;  %vm27_vm0 = vcmask 254976   ;;  %s49_s0 = inlined_call_operand.vmem [shape: f32[2,32], index: 0, kind: input, shape index: {}]   ;;  %s50_s1 = inlined_call_operand.vmem [shape: f32[2,32], index: 1, kind: output, shape index: {}]  }
   0x1   :  { %v8_v1 = vld [vmem:[%s49_s0] sm:$0x3] }
   0x2   :  { %v10_v2 = vand.u32 127, %v9_v0  ;;  %v24_v3 = vmax.f32 %v8_v1, 0.0  ;;  %v25_v4 = vmin.f32 %v8_v1, 16.0 }
   0x4   :  { %v15_v5 = vand.u32 3, %v10_v2 }
   0x6   :  { %vm23_vm1 = vcmp.lt.s32.totalorder %v15_v5, 2 }
   0x7   :  { %v26_v6 = vsel %vm23_vm1, %v24_v3, %v25_v4 }
   0x8   :  { %28 = vst.msk [vmem:[%s50_s1] sm:$0x3] %vm27_vm0, %v26_v6 }

</bundles_post_ra>
